<compile_context>
chip_gen: v6e
topology: v6e:2x2x1
jax: 0.10.0
libtpu: 0.0.40
codegen_flags: <defaults>
</compile_context>

<pallas_src>
from functools import partial
from typing import Callable, List

import jax
import jax.numpy as jnp
from jax.experimental import pallas as pl
from jax.experimental.pallas import tpu as pltpu

_LANE = 128  # TPU vreg lane width


def _round_up(n: int, m: int) -> int:
    return ((n + m - 1) // m) * m


def _relu(v):
    return jnp.maximum(v, 0.0)


# -----------------------------------------------------------------------------
# Fused kernel: all hidden layers + all heads, one batch tile per grid step.
#   x_ref : (TB, in_pad)        batch tile (auto double-buffered)
#   p_ref : (R, W_slab)         packed parameter slab, VMEM-resident (idx (0,0))
#   o_ref : (TB, P)             lane-dense packed head output
# `layout` is a static tuple of (w_row_off, w_rows, out_cols_padded, b_row_off).
# -----------------------------------------------------------------------------
def _fused_mlp_kernel(x_ref, p_ref, o_ref, *, layout, num_hidden, activation):
    h = x_ref[...].astype(jnp.float32)
    for i, (w_off, w_rows, cols, b_off) in enumerate(layout):
        w = p_ref[w_off:w_off + w_rows, :cols]     # static, tile-aligned view
        b = p_ref[b_off:b_off + 1, :cols]          # (1, cols), broadcasts
        if w.dtype != jnp.float32:                 # bf16 weights -> bf16 MXU feed
            h = h.astype(w.dtype)
        h = jnp.dot(h, w, preferred_element_type=jnp.float32)
        h = h + b.astype(jnp.float32)              # bias/activation in f32 (v5e-safe)
        if i < num_hidden:
            h = activation(h)
    o_ref[...] = h.astype(o_ref.dtype)             # single lane-dense store


# -----------------------------------------------------------------------------
# Parameter construction (deterministic, PyTorch-style uniform init).
# W stored as (fan_in, fan_out); b as (1, fan_out).
# -----------------------------------------------------------------------------
def init_default_network(key, in_dim: int, hidden_layer_sizes: List[int],
                         out_dims: List[int], dtype=jnp.float32):
    def init_linear(k, fan_in, fan_out):
        kw, kb = jax.random.split(k)
        bound = 1.0 / float(fan_in) ** 0.5
        w = jax.random.uniform(kw, (fan_in, fan_out), jnp.float32, -bound, bound)
        b = jax.random.uniform(kb, (1, fan_out), jnp.float32, -bound, bound)
        return w.astype(dtype), b.astype(dtype)

    hidden_params, prev = [], in_dim
    for n in hidden_layer_sizes:
        key, sub = jax.random.split(key)
        hidden_params.append(init_linear(sub, prev, n))
        prev = n

    head_params = []
    for d in out_dims:
        key, sub = jax.random.split(key)
        head_params.append(init_linear(sub, hidden_layer_sizes[-1], d))
    return hidden_params, head_params


def pack_network_params(in_dim: int, hidden_params, head_params, dtype=jnp.float32):
    """Pack every parameter into ONE (8,128)-tile-aligned slab (rows, W_slab).
    Hidden dims are zero-padded to 128 lanes; heads are concatenated and
    zero-padded to a 128 multiple. Returns (slab, layout, out_dims, in_pad, P)."""
    itemsize = jnp.dtype(dtype).itemsize
    row_align = max(8, 32 // itemsize)               # 8 for f32, 16 for bf16

    hidden_sizes = [int(w.shape[1]) for w, _ in hidden_params]
    out_dims = tuple(int(w.shape[1]) for w, _ in head_params)

    in_pad = _round_up(in_dim, row_align)
    hid_pad = [_round_up(n, _LANE) for n in hidden_sizes]
    head_pad = _round_up(max(sum(out_dims), 1), _LANE)
    w_slab = max(max(hid_pad) if hid_pad else _LANE, head_pad)

    # Row layout: [W0 | b0 | W1 | b1 | ... | W_heads | b_heads], each block
    # starting on a sublane-tile boundary so in-kernel views are zero-cost.
    layout, row, in_rows = [], 0, in_pad
    for n_pad in hid_pad:
        w_off, row = row, row + in_rows
        b_off, row = row, row + row_align
        layout.append((w_off, in_rows, n_pad, b_off))
        in_rows = n_pad
    w_off, row = row, row + in_rows
    b_off, row = row, row + row_align
    layout.append((w_off, in_rows, head_pad, b_off))
    n_rows = row

    slab = jnp.zeros((n_rows, w_slab), dtype)
    for (w, b), (woff, _, _, boff) in zip(hidden_params, layout[:-1]):
        fi, fo = w.shape
        slab = slab.at[woff:woff + fi, :fo].set(w.astype(dtype))
        slab = slab.at[boff:boff + 1, :fo].set(b.reshape(1, -1).astype(dtype))
    woff, _, _, boff = layout[-1]
    off = 0
    for w, b in head_params:                          # concatenated heads
        fi, fo = w.shape
        slab = slab.at[woff:woff + fi, off:off + fo].set(w.astype(dtype))
        slab = slab.at[boff:boff + 1, off:off + fo].set(b.reshape(1, -1).astype(dtype))
        off += fo
    return slab, tuple(layout), out_dims, in_pad, head_pad


# -----------------------------------------------------------------------------
# Forward pass (mirrors DefaultNetwork.forward) — one fused pallas_call.
# -----------------------------------------------------------------------------
def default_network_forward(x, slab, layout, out_dims, in_pad, head_pad,
                            activation: Callable = _relu,
                            return_packed: bool = False,
                            batch_tile: int = None):
    assert x.ndim == 2
    B, D = x.shape
    num_hidden = len(layout) - 1

    # Batch tile: multiple of 8, capped at 256 (vreg pressure / VMEM budget).
    TB = batch_tile or min(_round_up(max(B, 1), 8), 256)
    B_pad = _round_up(B, TB)
    xp = x
    if B != B_pad or D != in_pad:
        xp = jnp.zeros((B_pad, in_pad), x.dtype).at[:B, :D].set(x)

    R, Wslab = slab.shape
    flops = sum(2 * B_pad * w_rows * cols for (_, w_rows, cols, _) in layout)
    bytes_accessed = (xp.size * xp.dtype.itemsize
                      + slab.size * slab.dtype.itemsize
                      + B_pad * head_pad * 4)

    out = pl.pallas_call(
        partial(_fused_mlp_kernel, layout=layout, num_hidden=num_hidden,
                activation=activation),
        out_shape=jax.ShapeDtypeStruct((B_pad, head_pad), jnp.float32),
        grid=(B_pad // TB,),
        in_specs=[
            pl.BlockSpec((TB, in_pad), lambda i: (i, 0)),   # batch tile, pipelined
            pl.BlockSpec((R, Wslab), lambda i: (0, 0)),     # params: loaded once, resident
        ],
        out_specs=pl.BlockSpec((TB, head_pad), lambda i: (i, 0)),
        compiler_params=pltpu.CompilerParams(
            dimension_semantics=("parallel",)),             # both TCs on v7x
        cost_estimate=pl.CostEstimate(flops=flops, transcendentals=0,
                                      bytes_accessed=bytes_accessed),
    )(xp, slab)

    out = out[:B]
    if return_packed:       # preferred for downstream consumers (no narrow slices)
        return out
    heads, off = [], 0
    for d in out_dims:
        heads.append(out[:, off:off + d])
        off += d
    return heads


# Pure-JAX reference for correctness checking.
def reference_forward(x, hidden_params, head_params, activation: Callable = _relu):
    h = x
    for w, b in hidden_params:
        h = activation(h @ w + b)
    return [h @ w + b for w, b in head_params]


if __name__ == "__main__":
    # DefaultNetwork(in_dim=32, hidden_layer_sizes=[64, 64],
    #                out_dims=[4, 2], activation_fn=nn.ReLU)
    B, IN_DIM = 8, 32
    HIDDEN = [64, 64]
    OUT_DIMS = [4, 2]

    key = jax.random.PRNGKey(0)
    key, kx = jax.random.split(key)
    x = jax.random.normal(kx, (B, IN_DIM), dtype=jnp.float32)

    # f32 params for a bit-tight check; pass dtype=jnp.bfloat16 to halve weight
    # DMA bytes on v6e/v7x (tolerance then ~1e-2; accumulate stays f32).
    hidden_params, head_params = init_default_network(key, IN_DIM, HIDDEN, OUT_DIMS)
    slab, layout, out_dims, in_pad, head_pad = pack_network_params(
        IN_DIM, hidden_params, head_params)

    @jax.jit
    def fwd(x_in, slab_in):
        return default_network_forward(x_in, slab_in, layout, out_dims,
                                       in_pad, head_pad, activation=_relu)

    outs = fwd(x, slab)
    outs = [jax.block_until_ready(o) for o in outs]

    refs = reference_forward(x, hidden_params, head_params)
    for o, r, d in zip(outs, refs, OUT_DIMS):
        assert o.shape == (B, d), (o.shape, (B, d))
        assert jnp.allclose(o, r, atol=1e-5, rtol=1e-5), "mismatch vs reference"

    print("KERNEL_OK")
</pallas_src>

<mosaic_0001>
module attributes {stable_mosaic.version = 11 : i64} {
  func.func @_fused_mlp_kernel(%arg0: i32, %arg1: memref<8x32xf32, #tpu.memory_space<vmem>>, %arg2: memref<312x128xf32, #tpu.memory_space<vmem>>, %arg3: memref<8x128xf32, #tpu.memory_space<vmem>>) attributes {dimension_semantics = [#tpu.dimension_semantics<parallel>], iteration_bounds = array<i64: 1>, scalar_prefetch = 0 : i64, scratch_operands = 0 : i64, tpu.core_type = #tpu.core_type<tc>, window_params = [{transform_indices = @transform_0, window_bounds = array<i64: 8, 32>}, {pipeline_mode = #tpu.pipeline_mode<synchronous>, transform_indices = @transform_1, window_bounds = array<i64: 312, 128>}, {transform_indices = @transform_2, window_bounds = array<i64: 8, 128>}]} {
    %c0 = arith.constant 0 : index
    %c0_0 = arith.constant 0 : index
    %0 = vector.load %arg1[%c0, %c0_0] : memref<8x32xf32, #tpu.memory_space<vmem>>, vector<8x32xf32>
    %c0_1 = arith.constant 0 : index
    %c0_2 = arith.constant 0 : index
    %1 = vector.load %arg2[%c0_1, %c0_2] : memref<312x128xf32, #tpu.memory_space<vmem>>, vector<32x128xf32>
    %c32 = arith.constant 32 : index
    %c0_3 = arith.constant 0 : index
    %2 = vector.load %arg2[%c32, %c0_3] : memref<312x128xf32, #tpu.memory_space<vmem>>, vector<1x128xf32>
    %cst = arith.constant dense<0.000000e+00> : vector<8x128xf32>
    %3 = tpu.matmul %0, %1, %cst {dimension_numbers = #tpu.dot_dimension_numbers<[1], [0], [0], [1], [0, 0, 1, 1], [], []>} : vector<8x32xf32>, vector<32x128xf32>, vector<8x128xf32> -> vector<8x128xf32>
    %4 = vector.broadcast %2 : vector<1x128xf32> to vector<8x128xf32>
    %5 = arith.addf %3, %4 : vector<8x128xf32>
    %cst_4 = arith.constant 0.000000e+00 : f32
    %6 = vector.broadcast %cst_4 : f32 to vector<8x128xf32>
    %7 = arith.maximumf %5, %6 : vector<8x128xf32>
    %c40 = arith.constant 40 : index
    %c0_5 = arith.constant 0 : index
    %8 = vector.load %arg2[%c40, %c0_5] : memref<312x128xf32, #tpu.memory_space<vmem>>, vector<128x128xf32>
    %c168 = arith.constant 168 : index
    %c0_6 = arith.constant 0 : index
    %9 = vector.load %arg2[%c168, %c0_6] : memref<312x128xf32, #tpu.memory_space<vmem>>, vector<1x128xf32>
    %cst_7 = arith.constant dense<0.000000e+00> : vector<8x128xf32>
    %10 = tpu.matmul %7, %8, %cst_7 {dimension_numbers = #tpu.dot_dimension_numbers<[1], [0], [0], [1], [0, 0, 1, 1], [], []>} : vector<8x128xf32>, vector<128x128xf32>, vector<8x128xf32> -> vector<8x128xf32>
    %11 = vector.broadcast %9 : vector<1x128xf32> to vector<8x128xf32>
    %12 = arith.addf %10, %11 : vector<8x128xf32>
    %cst_8 = arith.constant 0.000000e+00 : f32
    %13 = vector.broadcast %cst_8 : f32 to vector<8x128xf32>
    %14 = arith.maximumf %12, %13 : vector<8x128xf32>
    %c176 = arith.constant 176 : index
    %c0_9 = arith.constant 0 : index
    %15 = vector.load %arg2[%c176, %c0_9] : memref<312x128xf32, #tpu.memory_space<vmem>>, vector<128x128xf32>
    %c304 = arith.constant 304 : index
    %c0_10 = arith.constant 0 : index
    %16 = vector.load %arg2[%c304, %c0_10] : memref<312x128xf32, #tpu.memory_space<vmem>>, vector<1x128xf32>
    %cst_11 = arith.constant dense<0.000000e+00> : vector<8x128xf32>
    %17 = tpu.matmul %14, %15, %cst_11 {dimension_numbers = #tpu.dot_dimension_numbers<[1], [0], [0], [1], [0, 0, 1, 1], [], []>} : vector<8x128xf32>, vector<128x128xf32>, vector<8x128xf32> -> vector<8x128xf32>
    %18 = vector.broadcast %16 : vector<1x128xf32> to vector<8x128xf32>
    %19 = arith.addf %17, %18 : vector<8x128xf32>
    %c0_12 = arith.constant 0 : index
    %c0_13 = arith.constant 0 : index
    %20 = vector.load %arg3[%c0_12, %c0_13] : memref<8x128xf32, #tpu.memory_space<vmem>>, vector<8x128xf32>
    tpu.vector_store %arg3[%c0_12, %c0_13], %19 {strides = array<i32>} : memref<8x128xf32, #tpu.memory_space<vmem>>, vector<8x128xf32>,
    return
  }
  func.func @transform_0(%arg0: i32) -> (i32, i32) {
    %c0_i32 = arith.constant 0 : i32
    %c0_i32_0 = arith.constant 0 : i32
    return %arg0, %c0_i32 : i32, i32
  }
  func.func @transform_1(%arg0: i32) -> (i32, i32) {
    %c0_i32 = arith.constant 0 : i32
    %c0_i32_0 = arith.constant 0 : i32
    %c0_i32_1 = arith.constant 0 : i32
    return %c0_i32, %c0_i32_0 : i32, i32
  }
  func.func @transform_2(%arg0: i32) -> (i32, i32) {
    %c0_i32 = arith.constant 0 : i32
    %c0_i32_0 = arith.constant 0 : i32
    return %arg0, %c0_i32 : i32, i32
  }
}

</mosaic_0001>

<bundles_post_ra>
// kernel: fwd.1
= control target key start
LH: loop header
LB: loop body
LE: loop exit
PB: predicated region body
PF: predicated region fallthrough
CT: control target
= control target key end

     0   :  { %7 = vsyncpa [#allocation3], 0  ;;  %s558_s0 = inlined_call_operand.hbm [shape: f32[8,32], index: 0, kind: input, shape index: {}]   ;;  %s559_s1 = inlined_call_operand.hbm [shape: f32[312,128], index: 1, kind: input, shape index: {}]   ;;  %s560_s2 = inlined_call_operand.vmem [shape: f32[8,128], index: 2, kind: output, shape index: {}]  }
   0x1   :  { %8 = vsyncpa [#allocation5], 0  ;;  %s486_s9 = smov [#allocation2]   ;;  %s487_s11 = smov [#allocation4]  }
   0x2   :  { %s15_s10 = sshll.u32 %s486_s9, 4  ;;  %s24_s12 = sshll.u32 %s487_s11, 4  ;;  %s16_s10 = int_to_ptr.vmem [resolvable:$true] %s15_s10  ;;  %s25_s12 = int_to_ptr.vmem [resolvable:$true] %s24_s12 }
   0x3   :  { %s450_s13 = scalar_lea.vmem %s16_s10, 128  ;;  %p455_p1 = scmp.lt.s32.totalorder %s16_s10, %s16_s10 }
   0x4   :  { %p451_p0 = scmp.ne.s32.totalorder %s16_s10, %s450_s13  ;;  %p456_p2 = scmp.lt.s32.totalorder %s450_s13, %s450_s13 }
   0x6   :  { %p457_p3 = por %p456_p2, %p455_p1 }
   0x8   :  { %p458_p4 = pnand %p457_p3, %p451_p0 }
   0xa   :  { %461 = shalt.err (!%p458_p4)
}
   0xb   :  { %18 = dma.hbm_to_vmem [thread:$0]  %s558_s0, 128, %s16_s10, [#allocation3]  }
   0xc   :  { %s470_s16 = scalar_lea.vmem %s25_s12, 4992  ;;  %p475_p6 = scmp.lt.s32.totalorder %s25_s12, %s25_s12 }
   0xd   :  { %p471_p5 = scmp.ne.s32.totalorder %s25_s12, %s470_s16  ;;  %p476_p7 = scmp.lt.s32.totalorder %s470_s16, %s470_s16 }
   0xf   :  { %p477_p8 = por %p476_p7, %p475_p6 }
  0x11   :  { %p478_p9 = pnand %p477_p8, %p471_p5 }
  0x13   :  { %481 = shalt.err (!%p478_p9)
}
  0x14   :  { %s488_s17 = smov 128   ;;  %s489_s18 = smov 8  }
  0x15   :  { %30 = dma.hbm_to_vmem [thread:$0]  %s559_s1, 4992, %s25_s12, [#allocation5], %s488_s17, %s488_s17, %s489_s18  }
  0x16   :  { %482 = dma.done.wait [#allocation3], 128  }
  0x17   :  { %483 = vsyncadd [#allocation3], 4294967168 }
  0x18   :  { %484 = dma.done.wait [#allocation5], 4992  }
  0x19   :  { %485 = vsyncadd [#allocation5], 4294962304  ;;  %v490_v0 = vmov 0.0   ;;  %vm491_vm0 = vmmov 0   ;;  %v41_v1 = vld [vmem:[#allocation4 + $0x18] sm:$0xff]  ;;  %v40_v2 = vld [vmem:[#allocation4 + $0x10] sm:$0xff] }
  0x1a   :  { %355 = vmatprep.subr.mxu0 %v490_v0  ;;  %363 = vmatprep.mubr.msk.f32.mxu0 %vm491_vm0, %v490_v0  ;;  %v137_v3 = vld [vmem:[#allocation4 + $0xa0] sm:$0xff]  ;;  %v39_v4 = vld [vmem:[#allocation4 + $0x8] sm:$0xff]  ;;  %v136_v5 = vld [vmem:[#allocation4 + $0x98] sm:$0xff]  ;;  %vm47_vm1 = vcmask 261120  }
  0x1b   :  { %366 = vmatprep.subr.mxu1 %v490_v0  ;;  %398 = vmatprep.mubr.msk.f32.mxu1 %vm491_vm0, %v490_v0  ;;  %v135_v6 = vld [vmem:[#allocation4 + $0x90] sm:$0xff]  ;;  %v38_v7 = vld [vmem:[#allocation4] sm:$0xff]  ;;  %v37_v8 = vld [vmem:[#allocation2] sm:$0xff] }
  0x1c   :  { %356 = vmatpush3.msra.mxu0 %v41_v1  ;;  %367 = vmatpush3.msra.mxu1 %v137_v3  ;;  %v134_v9 = vld [vmem:[#allocation4 + $0x88] sm:$0xff]  ;;  %v133_v10 = vld [vmem:[#allocation4 + $0x80] sm:$0xff]  ;;  %v132_v11 = vld [vmem:[#allocation4 + $0x78] sm:$0xff] }
  0x1d   :  { %357 = vmatprep.subr.mxu0 %v490_v0  ;;  %368 = vmatprep.subr.mxu1 %v490_v0  ;;  %v131_v12 = vld [vmem:[#allocation4 + $0x70] sm:$0xff]  ;;  %v130_v13 = vld [vmem:[#allocation4 + $0x68] sm:$0xff]  ;;  %v129_v14 = vld [vmem:[#allocation4 + $0x60] sm:$0xff] }
  0x1e   :  { %358 = vmatpush3.msra.mxu0 %v40_v2  ;;  %369 = vmatpush3.msra.mxu1 %v136_v5  ;;  %v128_v15 = vld [vmem:[#allocation4 + $0x58] sm:$0xff]  ;;  %v127_v16 = vld [vmem:[#allocation4 + $0x50] sm:$0xff]  ;;  %v126_v17 = vld [vmem:[#allocation4 + $0x48] sm:$0xff] }
  0x1f   :  { %359 = vmatprep.subr.mxu0 %v490_v0  ;;  %370 = vmatprep.subr.mxu1 %v490_v0  ;;  %v125_v18 = vld [vmem:[#allocation4 + $0x40] sm:$0xff]  ;;  %v124_v19 = vld [vmem:[#allocation4 + $0x38] sm:$0xff]  ;;  %v123_v20 = vld [vmem:[#allocation4 + $0x30] sm:$0xff] }
  0x20   :  { %360 = vmatpush3.msra.mxu0 %v39_v4  ;;  %371 = vmatpush3.msra.mxu1 %v135_v6  ;;  %v122_v21 = vld [vmem:[#allocation4 + $0x28] sm:$0xff]  ;;  %v228_v23 = vld [vmem:[#allocation4 + $0x120] sm:$0xff]  ;;  %v227_v24 = vld [vmem:[#allocation4 + $0x118] sm:$0xff] }
  0x21   :  { %361 = vmatprep.subr.mxu0 %v490_v0  ;;  %372 = vmatprep.subr.mxu1 %v490_v0  ;;  %v229_v22 = vld [vmem:[#allocation4 + $0x128] sm:$0xff]  ;;  %v226_v25 = vld [vmem:[#allocation4 + $0x110] sm:$0xff]  ;;  %v224_v27 = vld [vmem:[#allocation4 + $0x100] sm:$0xff] }
  0x22   :  { %362 = vmatpush3.msra.mxu0 %v38_v7  ;;  %373 = vmatpush3.msra.mxu1 %v134_v9  ;;  %v225_v26 = vld [vmem:[#allocation4 + $0x108] sm:$0xff]  ;;  %v223_v28 = vld [vmem:[#allocation4 + $0xf8] sm:$0xff]  ;;  %v222_v29 = vld [vmem:[#allocation4 + $0xf0] sm:$0xff] }
  0x23   :  { %364 = vmatmul.mubr.msk.f32.vlgmr.msra.gmra.mxu0 %vm47_vm1, %v37_v8  ;;  %374 = vmatprep.subr.mxu1 %v490_v0  ;;  %v221_v30 = vld [vmem:[#allocation4 + $0xe8] sm:$0xff]  ;;  %v220_v31 = vld [vmem:[#allocation4 + $0xe0] sm:$0xff]  ;;  %v219_v32 = vld [vmem:[#allocation4 + $0xd8] sm:$0xff] }
  0x24   :  { %401 = vmatprep.subr.mxu0 %v490_v0  ;;  %375 = vmatpush3.msra.mxu1 %v133_v10  ;;  %v218_v33 = vld [vmem:[#allocation4 + $0xd0] sm:$0xff]  ;;  %v217_v34 = vld [vmem:[#allocation4 + $0xc8] sm:$0xff]  ;;  %v312_v35 = vld [vmem:[#allocation4 + $0x20] ss:$0 sm:$0xff] }
  0x25   :  { %433 = vmatprep.mubr.msk.f32.mxu0 %vm491_vm0, %v490_v0  ;;  %376 = vmatprep.subr.mxu1 %v490_v0  ;;  %v216_v40 = vld [vmem:[#allocation4 + $0xc0] sm:$0xff]  ;;  %v215_v41 = vld [vmem:[#allocation4 + $0xb8] sm:$0xff]  ;;  %v214_v42 = vld [vmem:[#allocation4 + $0xb0] sm:$0xff] }
  0x26   :  { %377 = vmatpush3.msra.mxu1 %v132_v11  ;;  %402 = vmatpush3.msra.mxu0 %v229_v22  ;;  %v314_v43 = vld [vmem:[#allocation4 + $0xa8] ss:$0 sm:$0xff]  ;;  %v315_v48 = vld [vmem:[#allocation4 + $0x130] ss:$0 sm:$0xff] }
  0x27   :  { %378 = vmatprep.subr.mxu1 %v490_v0  ;;  %403 = vmatprep.subr.mxu0 %v490_v0 }
  0x28   :  { %379 = vmatpush3.msra.mxu1 %v131_v12  ;;  %404 = vmatpush3.msra.mxu0 %v228_v23 }
  0x29   :  { %380 = vmatprep.subr.mxu1 %v490_v0  ;;  %405 = vmatprep.subr.mxu0 %v490_v0 }
  0x2a   :  { %381 = vmatpush3.msra.mxu1 %v130_v13  ;;  %406 = vmatpush3.msra.mxu0 %v227_v24 }
  0x2b   :  { %382 = vmatprep.subr.mxu1 %v490_v0  ;;  %407 = vmatprep.subr.mxu0 %v490_v0 }
  0x2c   :  { %383 = vmatpush3.msra.mxu1 %v129_v14  ;;  %408 = vmatpush3.msra.mxu0 %v226_v25 }
  0x2d   :  { %384 = vmatprep.subr.mxu1 %v490_v0  ;;  %409 = vmatprep.subr.mxu0 %v490_v0 }
  0x2e   :  { %385 = vmatpush3.msra.mxu1 %v128_v15  ;;  %410 = vmatpush3.msra.mxu0 %v225_v26 }
  0x2f   :  { %386 = vmatprep.subr.mxu1 %v490_v0  ;;  %411 = vmatprep.subr.mxu0 %v490_v0 }
  0x30   :  { %387 = vmatpush3.msra.mxu1 %v127_v16  ;;  %412 = vmatpush3.msra.mxu0 %v224_v27 }
  0x31   :  { %388 = vmatprep.subr.mxu1 %v490_v0  ;;  %413 = vmatprep.subr.mxu0 %v490_v0 }
  0x32   :  { %389 = vmatpush3.msra.mxu1 %v126_v17  ;;  %414 = vmatpush3.msra.mxu0 %v223_v28 }
  0x33   :  { %390 = vmatprep.subr.mxu1 %v490_v0  ;;  %415 = vmatprep.subr.mxu0 %v490_v0 }
  0x34   :  { %391 = vmatpush3.msra.mxu1 %v125_v18  ;;  %416 = vmatpush3.msra.mxu0 %v222_v29 }
  0x35   :  { %392 = vmatprep.subr.mxu1 %v490_v0  ;;  %417 = vmatprep.subr.mxu0 %v490_v0 }
  0x36   :  { %393 = vmatpush3.msra.mxu1 %v124_v19  ;;  %418 = vmatpush3.msra.mxu0 %v221_v30 }
  0x37   :  { %394 = vmatprep.subr.mxu1 %v490_v0  ;;  %419 = vmatprep.subr.mxu0 %v490_v0 }
  0x38   :  { %395 = vmatpush3.msra.mxu1 %v123_v20  ;;  %420 = vmatpush3.msra.mxu0 %v220_v31 }
  0x39   :  { %396 = vmatprep.subr.mxu1 %v490_v0  ;;  %421 = vmatprep.subr.mxu0 %v490_v0 }
  0x3a   :  { %397 = vmatpush3.msra.mxu1 %v122_v21  ;;  %422 = vmatpush3.msra.mxu0 %v219_v32 }
  0x3b   :  { %423 = vmatprep.subr.mxu0 %v490_v0 }
  0x3c   :  { %424 = vmatpush3.msra.mxu0 %v218_v33 }
  0x3d   :  { %425 = vmatprep.subr.mxu0 %v490_v0 }
  0x3e   :  { %426 = vmatpush3.msra.mxu0 %v217_v34 }
  0x3f   :  { %427 = vmatprep.subr.mxu0 %v490_v0 }
  0x40   :  { %428 = vmatpush3.msra.mxu0 %v216_v40 }
  0x41   :  { %429 = vmatprep.subr.mxu0 %v490_v0 }
  0x42   :  { %430 = vmatpush3.msra.mxu0 %v215_v41 }
  0x43   :  { %431 = vmatprep.subr.mxu0 %v490_v0 }
  0x44   :  { %432 = vmatpush3.msra.mxu0 %v214_v42 }
  0xe3   :  { %v117_v36 = vpop.f32.mrf.mxu0 }
  0xe4   :  { %v118_v37 = vadd.f32 %v312_v35, %v117_v36 }
  0xe5   :  { %v365_v38 = vpop.f32.mrf.mxu0 }
  0xe6   :  { %v121_v39 = vmax.f32 %v118_v37, 0.0 }
  0xe8   :  { %399 = vmatmul.mubr.f32.vlgmr.msra.gmra.mxu1 %v121_v39 }
 0x1a8   :  { %v209_v44 = vpop.f32.mrf.mxu1 }
 0x1a9   :  { %v210_v45 = vadd.f32 %v314_v43, %v209_v44 }
 0x1aa   :  { %v400_v46 = vpop.f32.mrf.mxu1 }
 0x1ab   :  { %v213_v47 = vmax.f32 %v210_v45, 0.0 }
 0x1ad   :  { %434 = vmatmul.mubr.f32.vlgmr.msra.gmra.mxu0 %v213_v47 }
 0x26d   :  { %v301_v49 = vpop.f32.mrf.mxu0 }
 0x26e   :  { %v302_v50 = vadd.f32 %v315_v48, %v301_v49 }
 0x26f   :  { %v435_v51 = vpop.f32.mrf.mxu0 }
 0x270   :  { %305 = vst [vmem:[%s560_s2] sm:$0xff] %v302_v50 }
 0x271   :  { %310 = vsyncpa [#allocation3], 1 }
 0x272   :  { %311 = vsyncpa [#allocation5], 1 }

</bundles_post_ra>
